<compile_context>
chip_gen: v6e
topology: v6e:2x2x1
jax: 0.10.0
libtpu: 0.0.40
codegen_flags: <defaults>
</compile_context>

<pallas_src>
import math
import numpy as np
import jax
import jax.numpy as jnp
from jax import lax
from jax.experimental import pallas as pl
from jax.experimental.pallas import tpu as pltpu


def _gelu_exact(x):
    # exact (erf-based) GELU, matching torch.nn.GELU() default
    return jax.nn.gelu(x, approximate=False)


def _probe_roll_like_jnp():
    """pltpu.roll is documented to match jnp.roll (out[i] = x[i - shift]); probe
    once on the device so the depthwise shifts are convention-proof."""
    def k(x_ref, o_ref):
        o_ref[...] = pltpu.roll(x_ref[...], 1, axis=1)
    x = jnp.broadcast_to(lax.iota(jnp.float32, 128), (8, 128))
    y = pl.pallas_call(k, out_shape=jax.ShapeDtypeStruct((8, 128), jnp.float32))(x)
    return bool(np.asarray(y)[0, 1] == 0.0)


def _tensorcores_per_chip():
    # v7x has 2 TensorCores/chip -> one image per grid step; v5e/v6e are single-TC.
    try:
        kind = jax.devices()[0].device_kind.lower()
    except Exception:
        return 1
    return 2 if ("v7" in kind or "7x" in kind) else 1


def _build_kernel(H, roll_like_jnp):
    """H = per-image row count (static).  The block may stack NB images along rows."""

    def _roll(v, shift, axis):
        n = v.shape[axis]
        s = shift % n
        if not roll_like_jnp:
            s = (n - s) % n
        return pltpu.roll(v, s, axis=axis)

    def kernel(x_ref, w1_ref, b1_ref, dw_ref, b2_ref, fold_ref,
               se1_ref, se2_ref, rep_ref, w2_ref, b3_ref, o_ref):
        R = x_ref.shape[0]                       # NB * H rows (images stacked)
        WH = w1_ref.shape[1]                     # W * hid lanes
        hid = fold_ref.shape[1]
        NB = R // H

        x = x_ref[...]                                           # (R, W*Cin) f32

        # ---- 1x1 expand conv (PreNorm BN + BN1 folded) + tanh-GELU ----
        h1 = jax.nn.gelu(
            jnp.dot(x.astype(jnp.bfloat16), w1_ref[...],
                    preferred_element_type=jnp.float32) + b1_ref[...],
            approximate=True)
        h1 = h1.astype(jnp.bfloat16)                             # (R, WH)

        # ---- 3x3 depthwise conv, stride 1, pad 1 (BN2 scale folded in taps) ----
        lane = lax.broadcasted_iota(jnp.int32, (1, WH), 1)
        row = lax.broadcasted_iota(jnp.int32, (R, 1), 0)
        left_ok = lane >= hid                    # column w-1 exists
        right_ok = lane < WH - hid               # column w+1 exists
        top_ok = (row % H) != 0                  # row h-1 exists (same image)
        bot_ok = (row % H) != (H - 1)            # row h+1 exists (same image)

        acc = None
        for ky in range(3):                      # dy = ky - 1
            # Lane-shifted neighbours recomputed per row: keeps the live-set at
            # ~(h1 + acc + temporaries) and pushes the shifts onto the idle XLU.
            vl = jnp.where(left_ok, _roll(h1, hid, 1), 0)        # column w-1
            vr = jnp.where(right_ok, _roll(h1, -hid, 1), 0)      # column w+1
            p = (vl * dw_ref[3 * ky + 0:3 * ky + 1, :]
                 + h1 * dw_ref[3 * ky + 1:3 * ky + 2, :]
                 + vr * dw_ref[3 * ky + 2:3 * ky + 3, :]).astype(jnp.float32)
            if ky == 0:                          # needs input row h-1
                p = jnp.where(top_ok, _roll(p, 1, 0), 0.0)
            elif ky == 2:                        # needs input row h+1
                p = jnp.where(bot_ok, _roll(p, -1, 0), 0.0)
            acc = p if acc is None else acc + p
        h2 = jax.nn.gelu(acc + b2_ref[...], approximate=True)    # (R, WH) f32

        # ---- SE: per-image avg pool -> fc -> GELU -> fc -> sigmoid -> gate ----
        h2b = h2.astype(jnp.bfloat16)
        folded = jnp.dot(h2b, fold_ref[...],                     # sum over W groups
                         preferred_element_type=jnp.float32)     # (R, hid)
        pooled = jnp.sum(folded.reshape(NB, H, hid), axis=1)     # (NB, hid) raw sum
        # The 1/(H*W) avg-pool divisor is folded into se1 host-side.
        t1 = _gelu_exact(jnp.dot(pooled, se1_ref[...],
                                 preferred_element_type=jnp.float32))      # (NB, se_pad)
        gate = jax.nn.sigmoid(jnp.dot(t1, se2_ref[...],
                                      preferred_element_type=jnp.float32))  # (NB, hid)
        gate_rows = jnp.broadcast_to(gate[:, None, :], (NB, H, hid)).reshape(R, hid)
        gate_big = jnp.dot(gate_rows.astype(jnp.bfloat16), rep_ref[...],
                           preferred_element_type=jnp.float32)   # (R, WH)
        h3 = (h2 * gate_big).astype(jnp.bfloat16)

        # ---- 1x1 project conv (BN3 folded) + residual ----
        out = jnp.dot(h3, w2_ref[...],
                      preferred_element_type=jnp.float32) + b3_ref[...]
        o_ref[...] = (x + out).astype(o_ref.dtype)               # unmasked 128-lane stores

    return kernel


def _prepare_weights(params, H, W):
    """Fold eval-mode BN into the conv weights and build the lane-dense
    block-diagonal / tiled operands.  Runs ONCE, outside the per-call path."""
    (s0, b0, w1, s1, b1, dw, s2, b2, se1, se2, w2, s3, b3) = params
    C, hid = w1.shape
    se_dim = se1.shape[1]

    # BN folding:  (x*s0+b0) @ w1 * s1 + b1  ==  x @ w1f + b1f ; etc.
    w1f = (s0.reshape(C, 1) * w1) * s1.reshape(1, hid)           # (C, hid)
    b1f = (b0 @ w1) * s1 + b1                                    # (1, hid)
    dwf = dw * s2.reshape(1, 1, hid)                             # (3, 3, hid)
    w2f = w2 * s3                                                # (hid, Cout)

    eyeW = jnp.eye(W, dtype=jnp.float32)
    w1_big = jnp.kron(eyeW, w1f).astype(jnp.bfloat16)            # (W*C,   W*hid)
    w2_big = jnp.kron(eyeW, w2f).astype(jnp.bfloat16)            # (W*hid, W*Cout)
    b1_big = jnp.tile(b1f, (1, W))                               # (1, W*hid)   f32
    b2_big = jnp.tile(b2, (1, W))                                # (1, W*hid)   f32
    b3_big = jnp.tile(b3, (1, W))                                # (1, W*Cout)  f32
    dw_big = jnp.tile(dwf.reshape(9, hid), (1, W)).astype(jnp.bfloat16)  # (9, W*hid)

    # SE plumbing matrices: fold (sum over W lane-groups) and replicate (inverse).
    eyeh = jnp.eye(hid, dtype=jnp.float32)
    fold = jnp.tile(eyeh, (W, 1)).astype(jnp.bfloat16)           # (W*hid, hid)
    rep = jnp.tile(eyeh, (1, W)).astype(jnp.bfloat16)            # (hid, W*hid)

    # SE fc weights: fold 1/(H*W) into fc1 and zero-pad se_dim to a sublane
    # multiple (exact: GELU(0)=0, padded rows of fc2 are zero).
    se_pad = -(-se_dim // 8) * 8
    se1p = jnp.zeros((hid, se_pad), jnp.float32).at[:, :se_dim].set(se1 / float(H * W))
    se2p = jnp.zeros((se_pad, hid), jnp.float32).at[:se_dim, :].set(se2)

    return (w1_big, b1_big, dw_big, b2_big, fold, se1p, se2p, rep, w2_big, b3_big)


def make_mbconv_forward(params, H, W):
    """Build a jitted MBConv forward; all weight reformatting happens here once."""
    C = params[2].shape[0]
    Cout = params[10].shape[1]
    ops = _prepare_weights(params, H, W)
    num_tc = _tensorcores_per_chip()
    kernel = _build_kernel(H, _probe_roll_like_jnp())

    def _const_spec(arr):                         # grid-invariant full-array block
        nd = arr.ndim
        return pl.BlockSpec(arr.shape, lambda b, _nd=nd: (0,) * _nd)

    @jax.jit
    def forward(x_nchw):
        N = x_nchw.shape[0]
        # v7x: one image per grid step (parallel -> one per TensorCore).
        # v5e/v6e (single TC): merge the whole batch into a single grid step.
        nb = 1 if (num_tc > 1 and N > 1) else N
        R = nb * H
        x_ld = jnp.transpose(x_nchw, (0, 2, 3, 1)).reshape(N * H, W * C)
        out_ld = pl.pallas_call(
            kernel,
            out_shape=jax.ShapeDtypeStruct((N * H, W * Cout), jnp.float32),
            grid_spec=pltpu.PrefetchScalarGridSpec(
                num_scalar_prefetch=0,
                grid=(N // nb,),
                in_specs=[pl.BlockSpec((R, W * C), lambda b: (b, 0))]
                         + [_const_spec(a) for a in ops],
                out_specs=pl.BlockSpec((R, W * Cout), lambda b: (b, 0)),
            ),
            compiler_params=pltpu.CompilerParams(
                dimension_semantics=("parallel",)),
        )(x_ld, *ops)
        return jnp.transpose(out_ld.reshape(N, H, W, Cout), (0, 3, 1, 2))

    return forward


def mbconv_reference(x_nchw, params):
    """Pure-JAX reference with the original (unfolded, f32, exact-GELU) math."""
    (s0, b0, w1, s1, b1, dw, s2, b2, se1, se2, w2, s3, b3) = params
    x = jnp.transpose(x_nchw, (0, 2, 3, 1))                  # (N, H, W, C)
    N, H, W, C = x.shape
    h = x * s0[0] + b0[0]
    h1 = _gelu_exact(jnp.einsum('nhwc,ce->nhwe', h, w1) * s1[0] + b1[0])
    hp = jnp.pad(h1, ((0, 0), (1, 1), (1, 1), (0, 0)))
    acc = jnp.zeros_like(h1)
    for ky in range(3):
        for kx in range(3):
            acc = acc + hp[:, ky:ky + H, kx:kx + W, :] * dw[ky, kx, :]
    h2 = _gelu_exact(acc * s2[0] + b2[0])
    ym = jnp.mean(h2, axis=(1, 2))                           # (N, hid)
    y = jax.nn.sigmoid(_gelu_exact(ym @ se1) @ se2)          # (N, hid)
    h3 = h2 * y[:, None, None, :]
    out = jnp.einsum('nhwe,eo->nhwo', h3, w2) * s3[0] + b3[0]
    return jnp.transpose(x + out, (0, 3, 1, 2))


def make_params(key, inp, oup, expansion=4):
    hid = int(inp * expansion)
    se_dim = max(int(inp * 0.25), 1)
    eps = 1e-5
    ks = jax.random.split(key, 16)

    def bn_fold(kg, kb, km, kv, dim):
        gamma = 1.0 + 0.1 * jax.random.normal(kg, (dim,), jnp.float32)
        beta = 0.1 * jax.random.normal(kb, (dim,), jnp.float32)
        mean = 0.1 * jax.random.normal(km, (dim,), jnp.float32)
        var = jnp.abs(jax.random.normal(kv, (dim,), jnp.float32)) + 0.5
        scale = gamma / jnp.sqrt(var + eps)
        bias = beta - mean * scale
        return scale.reshape(1, dim), bias.reshape(1, dim)

    s0, b0 = bn_fold(ks[0], ks[1], ks[2], ks[3], inp)           # PreNorm BN(inp)
    w1 = jax.random.normal(ks[4], (inp, hid), jnp.float32) * (1.0 / math.sqrt(inp))
    s1, b1 = bn_fold(ks[5], ks[6], ks[7], ks[3], hid)           # BN(hid)
    dw = jax.random.normal(ks[8], (3, 3, hid), jnp.float32) * (1.0 / 3.0)
    s2, b2 = bn_fold(ks[9], ks[10], ks[11], ks[7], hid)         # BN(hid)
    se1 = jax.random.normal(ks[12], (hid, se_dim), jnp.float32) * (1.0 / math.sqrt(hid))
    se2 = jax.random.normal(ks[13], (se_dim, hid), jnp.float32) * (1.0 / math.sqrt(se_dim))
    w2 = jax.random.normal(ks[14], (hid, oup), jnp.float32) * (1.0 / math.sqrt(hid))
    s3, b3 = bn_fold(ks[15], ks[0], ks[5], ks[9], oup)          # BN(oup)
    return (s0, b0, w1, s1, b1, dw, s2, b2, se1, se2, w2, s3, b3)


if __name__ == "__main__":
    # MBConv(inp=8, oup=8, kernel_size=3, downsample=False, expansion=4)
    N, C, H, W = 2, 8, 16, 16          # W*C = 128 -> exactly lane-dense rows
    key = jax.random.PRNGKey(0)
    kx, kp = jax.random.split(key)
    x = jax.random.normal(kx, (N, C, H, W), jnp.float32)
    params = make_params(kp, inp=C, oup=C, expansion=4)

    forward = make_mbconv_forward(params, H=H, W=W)   # weight prep runs once here
    out = jax.block_until_ready(forward(x))
    ref = jax.block_until_ready(mbconv_reference(x, params))

    assert out.shape == (N, C, H, W)
    # Kernel uses bf16 MXU operands + tanh-GELU; reference is f32 exact-GELU.
    np.testing.assert_allclose(np.asarray(out), np.asarray(ref), rtol=5e-2, atol=5e-2)

    print("KERNEL_OK")
</pallas_src>

<mosaic_0001>
module attributes {stable_mosaic.version = 11 : i64} {
  func.func @k(%arg0: memref<8x128xf32, #tpu.memory_space<vmem>>, %arg1: memref<8x128xf32, #tpu.memory_space<vmem>>) attributes {dimension_semantics = [], scalar_prefetch = 0 : i64, scratch_operands = 0 : i64, tpu.core_type = #tpu.core_type<tc>} {
    %c0 = arith.constant 0 : index
    %c0_0 = arith.constant 0 : index
    %0 = vector.load %arg0[%c0, %c0_0] : memref<8x128xf32, #tpu.memory_space<vmem>>, vector<8x128xf32>
    %c1_i32 = arith.constant 1 : i32
    %1 = tpu.dynamic_rotate %0 by %c1_i32 dim 1 : vector<8x128xf32>, i32 -> vector<8x128xf32>
    %c0_1 = arith.constant 0 : index
    %c0_2 = arith.constant 0 : index
    %2 = vector.load %arg1[%c0_1, %c0_2] : memref<8x128xf32, #tpu.memory_space<vmem>>, vector<8x128xf32>
    tpu.vector_store %arg1[%c0_1, %c0_2], %1 {strides = array<i32>} : memref<8x128xf32, #tpu.memory_space<vmem>>, vector<8x128xf32>,
    return
  }
}

</mosaic_0001>

<bundles_post_ra>
// kernel: tpu_custom_call.1
= control target key start
LH: loop header
LB: loop body
LE: loop exit
PB: predicated region body
PF: predicated region fallthrough
CT: control target
= control target key end

     0   :  { %6 = vsyncpa [#allocation3], 0  ;;  %s106_s0 = inlined_call_operand.hbm [shape: f32[8,128], index: 0, kind: input, shape index: {}]   ;;  %s107_s1 = inlined_call_operand.hbm [shape: f32[8,128], index: 1, kind: output, shape index: {}]  }
   0x1   :  { %7 = vsyncpa [#allocation4], 0  ;;  %s87_s6 = smov [#allocation2]  }
   0x2   :  { %s14_s7 = sshll.u32 %s87_s6, 4  ;;  %s15_s7 = int_to_ptr.vmem [resolvable:$true] %s14_s7 }
   0x3   :  { %s51_s8 = scalar_lea.vmem %s15_s7, 128  ;;  %p56_p1 = scmp.lt.s32.totalorder %s15_s7, %s15_s7 }
   0x4   :  { %p52_p0 = scmp.ne.s32.totalorder %s15_s7, %s51_s8  ;;  %p57_p2 = scmp.lt.s32.totalorder %s51_s8, %s51_s8 }
   0x6   :  { %p58_p3 = por %p57_p2, %p56_p1 }
   0x8   :  { %p59_p4 = pnand %p58_p3, %p52_p0 }
   0xa   :  { %62 = shalt.err (!%p59_p4)
}
   0xb   :  { %17 = dma.hbm_to_vmem [thread:$0]  %s106_s0, 128, %s15_s7, [#allocation3]  }
   0xc   :  { %83 = dma.done.wait [#allocation3], 128  }
   0xd   :  { %84 = vsyncadd [#allocation3], 4294967168  ;;  %v21_v0 = vld [vmem:[#allocation2] sm:$0xff]  ;;  %s88_s11 = smov 1   ;;  %s89_s12 = smov [#allocation5]  }
   0xe   :  { %22 = vrot.lane.b32.xlu0 %v21_v0, %s88_s11  ;;  %s31_s13 = sshll.u32 %s89_s12, 4  ;;  %s32_s13 = int_to_ptr.vmem [resolvable:$true] %s31_s13 }
   0xf   :  { %s63_s14 = scalar_lea.vmem %s32_s13, 128  ;;  %p68_p6 = scmp.lt.s32.totalorder %s32_s13, %s32_s13 }
  0x10   :  { %p64_p5 = scmp.ne.s32.totalorder %s32_s13, %s63_s14  ;;  %p69_p7 = scmp.lt.s32.totalorder %s63_s14, %s63_s14 }
  0x12   :  { %p70_p8 = por %p69_p7, %p68_p6 }
  0x14   :  { %p71_p9 = pnand %p70_p8, %p64_p5 }
  0x80   :  { %v23_v1 = vpop.permute.xlu0 %22 }
  0x81   :  { %24 = vst [vmem:[#allocation5] sm:$0xff] %v23_v1 }
  0x82   :  { %74 = shalt.err (!%p71_p9)
}
  0x83   :  { %34 = dma.vmem_to_hbm [thread:$0]  %s32_s13, 128, %s107_s1, [#allocation4]  }
  0x84   :  { %85 = dma.done.wait [#allocation4], 128  }
  0x85   :  { %86 = vsyncadd [#allocation4], 4294967168 }
  0x86   :  { %38 = vsyncpa [#allocation3], 1 }
  0x87   :  { %39 = vsyncpa [#allocation4], 1 }

</bundles_post_ra>
